<compile_context>
chip_gen: v7x
topology: tpu7x:2x2x1
jax: 0.10.0
libtpu: 0.0.40
codegen_flags: <defaults>
</compile_context>

<pallas_src>
import functools

import jax
import jax.numpy as jnp
from jax.experimental import pallas as pl
from jax.experimental.pallas import tpu as pltpu

SMOOTH = 1e-6
_LANES = 128
_MAX_TILE_ROWS = 4096


def _score_partials_kernel(pred_ref, labels_ref,
                           inter_out, psum_out, gsum_out,
                           inter_acc, psum_acc, gsum_acc,
                           *, has_padding):
    """Per-(split, batch) partial soft-Dice sums.

    pred_ref   : (1, C, SB, 128)  logits (any float dtype; f32 compute in-kernel)
    labels_ref : (1, SB, 128)     integer class labels, negative == spatial padding
    *_out      : (1, 1, C, 1)     f32 partial sums: intersection / pred-sum / gt-sum
    *_acc      : (C, 8, 128)      f32 scratch accumulators; persist across the
                                  innermost ('arbitrary') spatial grid axis.
    """
    s_idx = pl.program_id(2)

    @pl.when(s_idx == 0)
    def _init():
        zeros = jnp.zeros(inter_acc.shape, inter_acc.dtype)
        inter_acc[...] = zeros
        psum_acc[...] = zeros
        gsum_acc[...] = zeros

    x = pred_ref[0].astype(jnp.float32)            # (C, SB, 128)
    num_classes = x.shape[0]

    # softmax over the class (major) axis — reductions are C-1 elementwise VPU ops
    m = jnp.max(x, axis=0)                         # (SB, 128)
    e = jnp.exp(x - m)                             # (C, SB, 128)   (EUP)
    denom = jnp.sum(e, axis=0)                     # (SB, 128)
    # one reciprocal per pixel + C multiplies instead of C divides per pixel
    inv = pl.reciprocal(denom, approx=False)       # (SB, 128)

    lab = labels_ref[0].astype(jnp.int32)          # (SB, 128)
    if has_padding:
        valid = (lab >= 0).astype(jnp.float32)     # compiled out when no padding

    def vreg_sum(v):
        # (SB,128) -> (8,128): whole-vreg adds (VPU); the XLU cross-sublane/lane
        # reduction is deferred to the finalize block.
        return jnp.sum(v.reshape(-1, 8, _LANES), axis=0)

    # TODO(synk): for very large class counts switch this unrolled loop to a
    # broadcasted_iota one-hot; medical-seg C is small, so the unroll wins.
    for c in range(num_classes):
        p_c = e[c] * inv                                   # (SB, 128)
        onehot_c = (lab == c).astype(jnp.float32)          # (SB, 128)
        inter_acc[c] += vreg_sum(onehot_c * p_c)
        if has_padding:
            psum_acc[c] += vreg_sum(p_c * valid)
        else:
            psum_acc[c] += vreg_sum(p_c)
        gsum_acc[c] += vreg_sum(onehot_c)

    # The output block index is constant along the innermost 'arbitrary' axis, so
    # the block stays resident in VMEM; write it once at the end of the reduction.
    @pl.when(s_idx == pl.num_programs(2) - 1)
    def _finalize():
        def fold(acc):                                     # (C,8,128) -> (C,1)
            t = jnp.sum(acc[...], axis=1)                  # (C, 128)
            return jnp.sum(t, axis=1, keepdims=True)       # (C, 1)
        inter_out[0, 0] = fold(inter_acc)
        psum_out[0, 0] = fold(psum_acc)
        gsum_out[0, 0] = fold(gsum_acc)


def _round_up(x, m):
    return ((x + m - 1) // m) * m


def _vmem_budget_bytes():
    """(tile budget, vmem_limit) derived from physical VMEM per TensorCore."""
    try:
        phys = int(pltpu.get_tpu_info().vmem_capacity_bytes)
    except Exception:
        phys = 64 * 1024 * 1024            # conservative (v7x) — safe everywhere
    phys = max(32 * 1024 * 1024, min(phys, 128 * 1024 * 1024))
    budget = min((phys * 3) // 8, 48 * 1024 * 1024)          # tiles + working set
    limit = min((phys * 5) // 8, phys - 16 * 1024 * 1024, 96 * 1024 * 1024)
    limit = max(limit, budget + 8 * 1024 * 1024)
    return budget, limit


def _plan_tiles(rows, n_batch, c, pred_isz, lab_isz, budget):
    """Pick (n_split, n_per_split, tile_rows) from the VMEM budget."""
    # sublane-granule alignment required by the packed dtypes (8/16/32 rows)
    row_align = max(8 * (4 // pred_isz), 8 * (4 // lab_isz))
    # VMEM per 128-lane row: double-buffered input tiles + f32 softmax working set
    bytes_per_row = _LANES * (2 * (c * pred_isz + lab_isz) + 8 * c + 32)
    tile_target = min(_MAX_TILE_ROWS, max(1, budget // bytes_per_row))
    tile_target = max(row_align, (tile_target // row_align) * row_align)

    n_tiles = max(1, -(-rows // tile_target))
    # Use both TensorCores (v7x megacore) when the batch alone can't; on 1-TC
    # chips this is just one harmless extra grid step.
    if n_batch == 1 and n_tiles == 1 and rows >= 2 * row_align:
        n_tiles = 2
    if n_tiles > 1:
        n_split = 2
        n_tiles = _round_up(n_tiles, 2)
    else:
        n_split = 1
    tile_rows = _round_up(-(-rows // n_tiles), row_align)
    return n_split, n_tiles // n_split, tile_rows


def score_base_forward(logits_nchw, target_labels, weight=None, reduction="mean"):
    """ScoreBase.forward with prob_inputs=False, soft=True, ignore_idxs=None,
    weight=None, reduction='mean'; _compute_score = soft Dice per (batch, class)."""
    N, C, H, W = logits_nchw.shape
    S = H * W

    pred = logits_nchw.reshape(N, C, S)
    # Keep labels narrow if the caller already provides int8; otherwise int32
    # (converting int32 -> int8 here would cost an extra HBM pass, so don't).
    if target_labels.dtype == jnp.int8:
        labels = target_labels.reshape(N, S)
    else:
        labels = target_labels.astype(jnp.int32).reshape(N, S)

    pred_isz = jnp.dtype(pred.dtype).itemsize
    lab_isz = jnp.dtype(labels.dtype).itemsize

    rows = -(-S // _LANES)
    budget, vmem_limit = _vmem_budget_bytes()
    n_split, n_per_split, tile_rows = _plan_tiles(rows, N, C, pred_isz, lab_isz, budget)
    rows_padded = tile_rows * n_split * n_per_split

    flat_pad = rows_padded * _LANES - S
    has_padding = flat_pad > 0
    if has_padding:
        # TODO(synk): this is a full HBM copy of the logits; lane/tile-aligned
        # spatial sizes (H*W a multiple of 128 * tile granule) skip it entirely.
        pred = jnp.pad(pred, ((0, 0), (0, 0), (0, flat_pad)))
        labels = jnp.pad(labels, ((0, 0), (0, flat_pad)), constant_values=-1)

    # spatial fills (sublane, lane); class stays a major dim so the softmax
    # reductions are elementwise over full vregs.
    pred = pred.reshape(N, C, rows_padded, _LANES)
    labels = labels.reshape(N, rows_padded, _LANES)

    kernel = functools.partial(_score_partials_kernel, has_padding=has_padding)
    part_shape = jax.ShapeDtypeStruct((n_split, N, C, 1), jnp.float32)
    part_spec = pl.BlockSpec((1, 1, C, 1), lambda sp, n, s: (sp, n, 0, 0))

    inter_p, psum_p, gsum_p = pl.pallas_call(
        kernel,
        out_shape=(part_shape, part_shape, part_shape),
        grid=(n_split, N, n_per_split),
        in_specs=[
            pl.BlockSpec((1, C, tile_rows, _LANES),
                         lambda sp, n, s: (n, 0, sp * n_per_split + s, 0)),
            pl.BlockSpec((1, tile_rows, _LANES),
                         lambda sp, n, s: (n, sp * n_per_split + s, 0)),
        ],
        out_specs=(part_spec, part_spec, part_spec),
        scratch_shapes=[
            pltpu.VMEM((C, 8, _LANES), jnp.float32),   # intersection
            pltpu.VMEM((C, 8, _LANES), jnp.float32),   # sum of probs
            pltpu.VMEM((C, 8, _LANES), jnp.float32),   # sum of one-hot gt
        ],
        compiler_params=pltpu.CompilerParams(
            dimension_semantics=("parallel", "parallel", "arbitrary"),
            vmem_limit_bytes=int(vmem_limit),
        ),
    )(pred, labels)

    # combine the per-core spatial splits, then the nonlinear Dice finalize
    inter = jnp.sum(inter_p[..., 0], axis=0)           # (N, C)
    psum = jnp.sum(psum_p[..., 0], axis=0)             # (N, C)
    gsum = jnp.sum(gsum_p[..., 0], axis=0)             # (N, C)
    scores = (2.0 * inter + SMOOTH) / (psum + gsum + SMOOTH)   # soft Dice per (N, C)

    # _apply_weight
    if weight is not None:
        scores = scores * weight[None, :]

    # _score_reduction
    if reduction == "mean":
        return jnp.mean(scores)
    if reduction == "sum":
        return jnp.sum(scores)
    return scores


def _reference_forward(logits_nchw, target_labels):
    """Pure-JAX reference mirroring the PyTorch semantics (sanity check)."""
    N, C, H, W = logits_nchw.shape
    gt = jnp.transpose(jax.nn.one_hot(target_labels, C, dtype=jnp.float32),
                       (0, 3, 1, 2))
    p = jax.nn.softmax(logits_nchw.astype(jnp.float32), axis=1)
    inter = jnp.sum(p * gt, axis=(2, 3))
    union = jnp.sum(p, axis=(2, 3)) + jnp.sum(gt, axis=(2, 3))
    dice = (2.0 * inter + SMOOTH) / (union + SMOOTH)
    return jnp.mean(dice)


if __name__ == "__main__":
    key = jax.random.PRNGKey(0)
    k1, k2 = jax.random.split(key)

    N, C, H, W = 2, 4, 16, 16
    logits = jax.random.normal(k1, (N, C, H, W), dtype=jnp.float32)     # inputs (NCHW)
    labels = jax.random.randint(k2, (N, H, W), 0, C, dtype=jnp.int32)   # target (class idx)

    out = jax.block_until_ready(score_base_forward(logits, labels))
    ref = jax.block_until_ready(_reference_forward(logits, labels))
    assert jnp.allclose(out, ref, atol=1e-5, rtol=1e-5), (out, ref)

    print("KERNEL_OK")
</pallas_src>

<mosaic_0001>
module attributes {stable_mosaic.version = 11 : i64} {
  func.func @_score_partials_kernel(%arg0: i32, %arg1: i32, %arg2: i32, %arg3: memref<1x4x8x128xf32, #tpu.memory_space<vmem>>, %arg4: memref<1x8x128xi32, #tpu.memory_space<vmem>>, %arg5: memref<1x1x4x1xf32, #tpu.memory_space<vmem>>, %arg6: memref<1x1x4x1xf32, #tpu.memory_space<vmem>>, %arg7: memref<1x1x4x1xf32, #tpu.memory_space<vmem>>, %arg8: memref<4x8x128xf32, #tpu.memory_space<vmem>>, %arg9: memref<4x8x128xf32, #tpu.memory_space<vmem>>, %arg10: memref<4x8x128xf32, #tpu.memory_space<vmem>>) attributes {dimension_semantics = [#tpu.dimension_semantics<parallel>, #tpu.dimension_semantics<parallel>, #tpu.dimension_semantics<arbitrary>], iteration_bounds = array<i64: 1, 2, 1>, scalar_prefetch = 0 : i64, scratch_operands = 3 : i64, tpu.core_type = #tpu.core_type<tc>, window_params = [{transform_indices = @transform_0, window_bounds = array<i64: 1, 4, 8, 128>}, {transform_indices = @transform_1, window_bounds = array<i64: 1, 8, 128>}, {transform_indices = @transform_2, window_bounds = array<i64: 1, 1, 4, 1>}, {transform_indices = @transform_3, window_bounds = array<i64: 1, 1, 4, 1>}, {transform_indices = @transform_4, window_bounds = array<i64: 1, 1, 4, 1>}]} {
    %c0_i32 = arith.constant 0 : i32
    %0 = arith.cmpi eq, %arg2, %c0_i32 : i32
    %1 = arith.extui %0 : i1 to i32
    %c0_i32_0 = arith.constant 0 : i32
    %2 = arith.cmpi ne, %1, %c0_i32_0 : i32
    scf.if %2 {
      %cst_93 = arith.constant 0.000000e+00 : f32
      %153 = vector.broadcast %cst_93 : f32 to vector<4x8x128xf32>
      %c0_94 = arith.constant 0 : index
      %c0_95 = arith.constant 0 : index
      %c0_96 = arith.constant 0 : index
      %154 = vector.load %arg8[%c0_94, %c0_95, %c0_96] : memref<4x8x128xf32, #tpu.memory_space<vmem>>, vector<4x8x128xf32>
      tpu.vector_store %arg8[%c0_94, %c0_95, %c0_96], %153 {strides = array<i32>} : memref<4x8x128xf32, #tpu.memory_space<vmem>>, vector<4x8x128xf32>,
      %c0_97 = arith.constant 0 : index
      %c0_98 = arith.constant 0 : index
      %c0_99 = arith.constant 0 : index
      %155 = vector.load %arg9[%c0_97, %c0_98, %c0_99] : memref<4x8x128xf32, #tpu.memory_space<vmem>>, vector<4x8x128xf32>
      tpu.vector_store %arg9[%c0_97, %c0_98, %c0_99], %153 {strides = array<i32>} : memref<4x8x128xf32, #tpu.memory_space<vmem>>, vector<4x8x128xf32>,
      %c0_100 = arith.constant 0 : index
      %c0_101 = arith.constant 0 : index
      %c0_102 = arith.constant 0 : index
      %156 = vector.load %arg10[%c0_100, %c0_101, %c0_102] : memref<4x8x128xf32, #tpu.memory_space<vmem>>, vector<4x8x128xf32>
      tpu.vector_store %arg10[%c0_100, %c0_101, %c0_102], %153 {strides = array<i32>} : memref<4x8x128xf32, #tpu.memory_space<vmem>>, vector<4x8x128xf32>,
    } else {
    }
    %c0 = arith.constant 0 : index
    %c0_1 = arith.constant 0 : index
    %c0_2 = arith.constant 0 : index
    %c0_3 = arith.constant 0 : index
    %3 = vector.load %arg3[%c0, %c0_1, %c0_2, %c0_3] : memref<1x4x8x128xf32, #tpu.memory_space<vmem>>, vector<1x4x8x128xf32>
    %4 = vector.shape_cast %3 : vector<1x4x8x128xf32> to vector<4x8x128xf32>
    %cst = arith.constant dense<0xFF800000> : vector<8x128xf32>
    %5 = vector.multi_reduction <maximumf>, %4, %cst [0] : vector<4x8x128xf32> to vector<8x128xf32>
    %6 = vector.shape_cast %5 : vector<8x128xf32> to vector<1x8x128xf32>
    %7 = vector.broadcast %6 : vector<1x8x128xf32> to vector<4x8x128xf32>
    %8 = arith.subf %4, %7 : vector<4x8x128xf32>
    %9 = math.exp %8 : vector<4x8x128xf32>
    %cst_4 = arith.constant dense<0.000000e+00> : vector<8x128xf32>
    %10 = vector.multi_reduction <add>, %9, %cst_4 [0] : vector<4x8x128xf32> to vector<8x128xf32>
    %11 = tpu.reciprocal %10 : vector<8x128xf32> -> vector<8x128xf32>
    %c0_5 = arith.constant 0 : index
    %c0_6 = arith.constant 0 : index
    %c0_7 = arith.constant 0 : index
    %12 = vector.load %arg4[%c0_5, %c0_6, %c0_7] : memref<1x8x128xi32, #tpu.memory_space<vmem>>, vector<1x8x128xi32>
    %13 = vector.shape_cast %12 : vector<1x8x128xi32> to vector<8x128xi32>
    %c0_i32_8 = arith.constant 0 : i32
    %14 = vector.broadcast %c0_i32_8 : i32 to vector<8x128xi32>
    %15 = arith.cmpi sge, %13, %14 : vector<8x128xi32>
    %16 = arith.extui %15 : vector<8x128xi1> to vector<8x128xi32>
    %17 = arith.sitofp %16 : vector<8x128xi32> to vector<8x128xf32>
    %18 = vector.extract_strided_slice %9 {offsets = [0, 0, 0], sizes = [1, 8, 128], strides = [1, 1, 1]} : vector<4x8x128xf32> to vector<1x8x128xf32>
    %19 = vector.shape_cast %18 : vector<1x8x128xf32> to vector<8x128xf32>
    %20 = arith.mulf %19, %11 : vector<8x128xf32>
    %c0_i32_9 = arith.constant 0 : i32
    %21 = vector.broadcast %c0_i32_9 : i32 to vector<8x128xi32>
    %22 = arith.cmpi eq, %13, %21 : vector<8x128xi32>
    %23 = arith.extui %22 : vector<8x128xi1> to vector<8x128xi32>
    %24 = arith.sitofp %23 : vector<8x128xi32> to vector<8x128xf32>
    %c0_10 = arith.constant 0 : index
    %c0_11 = arith.constant 0 : index
    %c0_12 = arith.constant 0 : index
    %25 = vector.load %arg8[%c0_10, %c0_11, %c0_12] : memref<4x8x128xf32, #tpu.memory_space<vmem>>, vector<1x8x128xf32>
    %26 = vector.shape_cast %25 : vector<1x8x128xf32> to vector<8x128xf32>
    %27 = arith.mulf %24, %20 : vector<8x128xf32>
    %28 = vector.shape_cast %27 : vector<8x128xf32> to vector<1x8x128xf32>
    %cst_13 = arith.constant dense<0.000000e+00> : vector<8x128xf32>
    %29 = vector.multi_reduction <add>, %28, %cst_13 [0] : vector<1x8x128xf32> to vector<8x128xf32>
    %30 = arith.addf %26, %29 : vector<8x128xf32>
    %c0_14 = arith.constant 0 : index
    %c0_15 = arith.constant 0 : index
    %c0_16 = arith.constant 0 : index
    %31 = vector.load %arg8[%c0_14, %c0_15, %c0_16] : memref<4x8x128xf32, #tpu.memory_space<vmem>>, vector<1x8x128xf32>
    %32 = vector.shape_cast %31 : vector<1x8x128xf32> to vector<8x128xf32>
    %33 = vector.shape_cast %30 : vector<8x128xf32> to vector<1x8x128xf32>
    tpu.vector_store %arg8[%c0_14, %c0_15, %c0_16], %33 {strides = array<i32>} : memref<4x8x128xf32, #tpu.memory_space<vmem>>, vector<1x8x128xf32>,
    %c0_17 = arith.constant 0 : index
    %c0_18 = arith.constant 0 : index
    %c0_19 = arith.constant 0 : index
    %34 = vector.load %arg9[%c0_17, %c0_18, %c0_19] : memref<4x8x128xf32, #tpu.memory_space<vmem>>, vector<1x8x128xf32>
    %35 = vector.shape_cast %34 : vector<1x8x128xf32> to vector<8x128xf32>
    %36 = arith.mulf %20, %17 : vector<8x128xf32>
    %37 = vector.shape_cast %36 : vector<8x128xf32> to vector<1x8x128xf32>
    %cst_20 = arith.constant dense<0.000000e+00> : vector<8x128xf32>
    %38 = vector.multi_reduction <add>, %37, %cst_20 [0] : vector<1x8x128xf32> to vector<8x128xf32>
    %39 = arith.addf %35, %38 : vector<8x128xf32>
    %c0_21 = arith.constant 0 : index
    %c0_22 = arith.constant 0 : index
    %c0_23 = arith.constant 0 : index
    %40 = vector.load %arg9[%c0_21, %c0_22, %c0_23] : memref<4x8x128xf32, #tpu.memory_space<vmem>>, vector<1x8x128xf32>
    %41 = vector.shape_cast %40 : vector<1x8x128xf32> to vector<8x128xf32>
    %42 = vector.shape_cast %39 : vector<8x128xf32> to vector<1x8x128xf32>
    tpu.vector_store %arg9[%c0_21, %c0_22, %c0_23], %42 {strides = array<i32>} : memref<4x8x128xf32, #tpu.memory_space<vmem>>, vector<1x8x128xf32>,
    %c0_24 = arith.constant 0 : index
    %c0_25 = arith.constant 0 : index
    %c0_26 = arith.constant 0 : index
    %43 = vector.load %arg10[%c0_24, %c0_25, %c0_26] : memref<4x8x128xf32, #tpu.memory_space<vmem>>, vector<1x8x128xf32>
    %44 = vector.shape_cast %43 : vector<1x8x128xf32> to vector<8x128xf32>
    %45 = vector.shape_cast %24 : vector<8x128xf32> to vector<1x8x128xf32>
    %cst_27 = arith.constant dense<0.000000e+00> : vector<8x128xf32>
    %46 = vector.multi_reduction <add>, %45, %cst_27 [0] : vector<1x8x128xf32> to vector<8x128xf32>
    %47 = arith.addf %44, %46 : vector<8x128xf32>
    %c0_28 = arith.constant 0 : index
    %c0_29 = arith.constant 0 : index
    %c0_30 = arith.constant 0 : index
    %48 = vector.load %arg10[%c0_28, %c0_29, %c0_30] : memref<4x8x128xf32, #tpu.memory_space<vmem>>, vector<1x8x128xf32>
    %49 = vector.shape_cast %48 : vector<1x8x128xf32> to vector<8x128xf32>
    %50 = vector.shape_cast %47 : vector<8x128xf32> to vector<1x8x128xf32>
    tpu.vector_store %arg10[%c0_28, %c0_29, %c0_30], %50 {strides = array<i32>} : memref<4x8x128xf32, #tpu.memory_space<vmem>>, vector<1x8x128xf32>,
    %51 = vector.extract_strided_slice %9 {offsets = [1, 0, 0], sizes = [1, 8, 128], strides = [1, 1, 1]} : vector<4x8x128xf32> to vector<1x8x128xf32>
    %52 = vector.shape_cast %51 : vector<1x8x128xf32> to vector<8x128xf32>
    %53 = arith.mulf %52, %11 : vector<8x128xf32>
    %c1_i32 = arith.constant 1 : i32
    %54 = vector.broadcast %c1_i32 : i32 to vector<8x128xi32>
    %55 = arith.cmpi eq, %13, %54 : vector<8x128xi32>
    %56 = arith.extui %55 : vector<8x128xi1> to vector<8x128xi32>
    %57 = arith.sitofp %56 : vector<8x128xi32> to vector<8x128xf32>
    %c1 = arith.constant 1 : index
    %c0_31 = arith.constant 0 : index
    %c0_32 = arith.constant 0 : index
    %58 = vector.load %arg8[%c1, %c0_31, %c0_32] : memref<4x8x128xf32, #tpu.memory_space<vmem>>, vector<1x8x128xf32>
    %59 = vector.shape_cast %58 : vector<1x8x128xf32> to vector<8x128xf32>
    %60 = arith.mulf %57, %53 : vector<8x128xf32>
    %61 = vector.shape_cast %60 : vector<8x128xf32> to vector<1x8x128xf32>
    %cst_33 = arith.constant dense<0.000000e+00> : vector<8x128xf32>
    %62 = vector.multi_reduction <add>, %61, %cst_33 [0] : vector<1x8x128xf32> to vector<8x128xf32>
    %63 = arith.addf %59, %62 : vector<8x128xf32>
    %c1_34 = arith.constant 1 : index
    %c0_35 = arith.constant 0 : index
    %c0_36 = arith.constant 0 : index
    %64 = vector.load %arg8[%c1_34, %c0_35, %c0_36] : memref<4x8x128xf32, #tpu.memory_space<vmem>>, vector<1x8x128xf32>
    %65 = vector.shape_cast %64 : vector<1x8x128xf32> to vector<8x128xf32>
    %66 = vector.shape_cast %63 : vector<8x128xf32> to vector<1x8x128xf32>
    tpu.vector_store %arg8[%c1_34, %c0_35, %c0_36], %66 {strides = array<i32>} : memref<4x8x128xf32, #tpu.memory_space<vmem>>, vector<1x8x128xf32>,
    %c1_37 = arith.constant 1 : index
    %c0_38 = arith.constant 0 : index
    %c0_39 = arith.constant 0 : index
    %67 = vector.load %arg9[%c1_37, %c0_38, %c0_39] : memref<4x8x128xf32, #tpu.memory_space<vmem>>, vector<1x8x128xf32>
    %68 = vector.shape_cast %67 : vector<1x8x128xf32> to vector<8x128xf32>
    %69 = arith.mulf %53, %17 : vector<8x128xf32>
    %70 = vector.shape_cast %69 : vector<8x128xf32> to vector<1x8x128xf32>
    %cst_40 = arith.constant dense<0.000000e+00> : vector<8x128xf32>
    %71 = vector.multi_reduction <add>, %70, %cst_40 [0] : vector<1x8x128xf32> to vector<8x128xf32>
    %72 = arith.addf %68, %71 : vector<8x128xf32>
    %c1_41 = arith.constant 1 : index
    %c0_42 = arith.constant 0 : index
    %c0_43 = arith.constant 0 : index
    %73 = vector.load %arg9[%c1_41, %c0_42, %c0_43] : memref<4x8x128xf32, #tpu.memory_space<vmem>>, vector<1x8x128xf32>
    %74 = vector.shape_cast %73 : vector<1x8x128xf32> to vector<8x128xf32>
    %75 = vector.shape_cast %72 : vector<8x128xf32> to vector<1x8x128xf32>
    tpu.vector_store %arg9[%c1_41, %c0_42, %c0_43], %75 {strides = array<i32>} : memref<4x8x128xf32, #tpu.memory_space<vmem>>, vector<1x8x128xf32>,
    %c1_44 = arith.constant 1 : index
    %c0_45 = arith.constant 0 : index
    %c0_46 = arith.constant 0 : index
    %76 = vector.load %arg10[%c1_44, %c0_45, %c0_46] : memref<4x8x128xf32, #tpu.memory_space<vmem>>, vector<1x8x128xf32>
    %77 = vector.shape_cast %76 : vector<1x8x128xf32> to vector<8x128xf32>
    %78 = vector.shape_cast %57 : vector<8x128xf32> to vector<1x8x128xf32>
    %cst_47 = arith.constant dense<0.000000e+00> : vector<8x128xf32>
    %79 = vector.multi_reduction <add>, %78, %cst_47 [0] : vector<1x8x128xf32> to vector<8x128xf32>
    %80 = arith.addf %77, %79 : vector<8x128xf32>
    %c1_48 = arith.constant 1 : index
    %c0_49 = arith.constant 0 : index
    %c0_50 = arith.constant 0 : index
    %81 = vector.load %arg10[%c1_48, %c0_49, %c0_50] : memref<4x8x128xf32, #tpu.memory_space<vmem>>, vector<1x8x128xf32>
    %82 = vector.shape_cast %81 : vector<1x8x128xf32> to vector<8x128xf32>
    %83 = vector.shape_cast %80 : vector<8x128xf32> to vector<1x8x128xf32>
    tpu.vector_store %arg10[%c1_48, %c0_49, %c0_50], %83 {strides = array<i32>} : memref<4x8x128xf32, #tpu.memory_space<vmem>>, vector<1x8x128xf32>,
    %84 = vector.extract_strided_slice %9 {offsets = [2, 0, 0], sizes = [1, 8, 128], strides = [1, 1, 1]} : vector<4x8x128xf32> to vector<1x8x128xf32>
    %85 = vector.shape_cast %84 : vector<1x8x128xf32> to vector<8x128xf32>
    %86 = arith.mulf %85, %11 : vector<8x128xf32>
    %c2_i32 = arith.constant 2 : i32
    %87 = vector.broadcast %c2_i32 : i32 to vector<8x128xi32>
    %88 = arith.cmpi eq, %13, %87 : vector<8x128xi32>
    %89 = arith.extui %88 : vector<8x128xi1> to vector<8x128xi32>
    %90 = arith.sitofp %89 : vector<8x128xi32> to vector<8x128xf32>
    %c2 = arith.constant 2 : index
    %c0_51 = arith.constant 0 : index
    %c0_52 = arith.constant 0 : index
    %91 = vector.load %arg8[%c2, %c0_51, %c0_52] : memref<4x8x128xf32, #tpu.memory_space<vmem>>, vector<1x8x128xf32>
    %92 = vector.shape_cast %91 : vector<1x8x128xf32> to vector<8x128xf32>
    %93 = arith.mulf %90, %86 : vector<8x128xf32>
    %94 = vector.shape_cast %93 : vector<8x128xf32> to vector<1x8x128xf32>
    %cst_53 = arith.constant dense<0.000000e+00> : vector<8x128xf32>
    %95 = vector.multi_reduction <add>, %94, %cst_53 [0] : vector<1x8x128xf32> to vector<8x128xf32>
    %96 = arith.addf %92, %95 : vector<8x128xf32>
    %c2_54 = arith.constant 2 : index
    %c0_55 = arith.constant 0 : index
    %c0_56 = arith.constant 0 : index
    %97 = vector.load %arg8[%c2_54, %c0_55, %c0_56] : memref<4x8x128xf32, #tpu.memory_space<vmem>>, vector<1x8x128xf32>
    %98 = vector.shape_cast %97 : vector<1x8x128xf32> to vector<8x128xf32>
    %99 = vector.shape_cast %96 : vector<8x128xf32> to vector<1x8x128xf32>
    tpu.vector_store %arg8[%c2_54, %c0_55, %c0_56], %99 {strides = array<i32>} : memref<4x8x128xf32, #tpu.memory_space<vmem>>, vector<1x8x128xf32>,
    %c2_57 = arith.constant 2 : index
    %c0_58 = arith.constant 0 : index
    %c0_59 = arith.constant 0 : index
    %100 = vector.load %arg9[%c2_57, %c0_58, %c0_59] : memref<4x8x128xf32, #tpu.memory_space<vmem>>, vector<1x8x128xf32>
    %101 = vector.shape_cast %100 : vector<1x8x128xf32> to vector<8x128xf32>
    %102 = arith.mulf %86, %17 : vector<8x128xf32>
    %103 = vector.shape_cast %102 : vector<8x128xf32> to vector<1x8x128xf32>
    %cst_60 = arith.constant dense<0.000000e+00> : vector<8x128xf32>
    %104 = vector.multi_reduction <add>, %103, %cst_60 [0] : vector<1x8x128xf32> to vector<8x128xf32>
    %105 = arith.addf %101, %104 : vector<8x128xf32>
    %c2_61 = arith.constant 2 : index
    %c0_62 = arith.constant 0 : index
    %c0_63 = arith.constant 0 : index
    %106 = vector.load %arg9[%c2_61, %c0_62, %c0_63] : memref<4x8x128xf32, #tpu.memory_space<vmem>>, vector<1x8x128xf32>
    %107 = vector.shape_cast %106 : vector<1x8x128xf32> to vector<8x128xf32>
    %108 = vector.shape_cast %105 : vector<8x128xf32> to vector<1x8x128xf32>
    tpu.vector_store %arg9[%c2_61, %c0_62, %c0_63], %108 {strides = array<i32>} : memref<4x8x128xf32, #tpu.memory_space<vmem>>, vector<1x8x128xf32>,
    %c2_64 = arith.constant 2 : index
    %c0_65 = arith.constant 0 : index
    %c0_66 = arith.constant 0 : index
    %109 = vector.load %arg10[%c2_64, %c0_65, %c0_66] : memref<4x8x128xf32, #tpu.memory_space<vmem>>, vector<1x8x128xf32>
    %110 = vector.shape_cast %109 : vector<1x8x128xf32> to vector<8x128xf32>
    %111 = vector.shape_cast %90 : vector<8x128xf32> to vector<1x8x128xf32>
    %cst_67 = arith.constant dense<0.000000e+00> : vector<8x128xf32>
    %112 = vector.multi_reduction <add>, %111, %cst_67 [0] : vector<1x8x128xf32> to vector<8x128xf32>
    %113 = arith.addf %110, %112 : vector<8x128xf32>
    %c2_68 = arith.constant 2 : index
    %c0_69 = arith.constant 0 : index
    %c0_70 = arith.constant 0 : index
    %114 = vector.load %arg10[%c2_68, %c0_69, %c0_70] : memref<4x8x128xf32, #tpu.memory_space<vmem>>, vector<1x8x128xf32>
    %115 = vector.shape_cast %114 : vector<1x8x128xf32> to vector<8x128xf32>
    %116 = vector.shape_cast %113 : vector<8x128xf32> to vector<1x8x128xf32>
    tpu.vector_store %arg10[%c2_68, %c0_69, %c0_70], %116 {strides = array<i32>} : memref<4x8x128xf32, #tpu.memory_space<vmem>>, vector<1x8x128xf32>,
    %117 = vector.extract_strided_slice %9 {offsets = [3, 0, 0], sizes = [1, 8, 128], strides = [1, 1, 1]} : vector<4x8x128xf32> to vector<1x8x128xf32>
    %118 = vector.shape_cast %117 : vector<1x8x128xf32> to vector<8x128xf32>
    %119 = arith.mulf %118, %11 : vector<8x128xf32>
    %c3_i32 = arith.constant 3 : i32
    %120 = vector.broadcast %c3_i32 : i32 to vector<8x128xi32>
    %121 = arith.cmpi eq, %13, %120 : vector<8x128xi32>
    %122 = arith.extui %121 : vector<8x128xi1> to vector<8x128xi32>
    %123 = arith.sitofp %122 : vector<8x128xi32> to vector<8x128xf32>
    %c3 = arith.constant 3 : index
    %c0_71 = arith.constant 0 : index
    %c0_72 = arith.constant 0 : index
    %124 = vector.load %arg8[%c3, %c0_71, %c0_72] : memref<4x8x128xf32, #tpu.memory_space<vmem>>, vector<1x8x128xf32>
    %125 = vector.shape_cast %124 : vector<1x8x128xf32> to vector<8x128xf32>
    %126 = arith.mulf %123, %119 : vector<8x128xf32>
    %127 = vector.shape_cast %126 : vector<8x128xf32> to vector<1x8x128xf32>
    %cst_73 = arith.constant dense<0.000000e+00> : vector<8x128xf32>
    %128 = vector.multi_reduction <add>, %127, %cst_73 [0] : vector<1x8x128xf32> to vector<8x128xf32>
    %129 = arith.addf %125, %128 : vector<8x128xf32>
    %c3_74 = arith.constant 3 : index
    %c0_75 = arith.constant 0 : index
    %c0_76 = arith.constant 0 : index
    %130 = vector.load %arg8[%c3_74, %c0_75, %c0_76] : memref<4x8x128xf32, #tpu.memory_space<vmem>>, vector<1x8x128xf32>
    %131 = vector.shape_cast %130 : vector<1x8x128xf32> to vector<8x128xf32>
    %132 = vector.shape_cast %129 : vector<8x128xf32> to vector<1x8x128xf32>
    tpu.vector_store %arg8[%c3_74, %c0_75, %c0_76], %132 {strides = array<i32>} : memref<4x8x128xf32, #tpu.memory_space<vmem>>, vector<1x8x128xf32>,
    %c3_77 = arith.constant 3 : index
    %c0_78 = arith.constant 0 : index
    %c0_79 = arith.constant 0 : index
    %133 = vector.load %arg9[%c3_77, %c0_78, %c0_79] : memref<4x8x128xf32, #tpu.memory_space<vmem>>, vector<1x8x128xf32>
    %134 = vector.shape_cast %133 : vector<1x8x128xf32> to vector<8x128xf32>
    %135 = arith.mulf %119, %17 : vector<8x128xf32>
    %136 = vector.shape_cast %135 : vector<8x128xf32> to vector<1x8x128xf32>
    %cst_80 = arith.constant dense<0.000000e+00> : vector<8x128xf32>
    %137 = vector.multi_reduction <add>, %136, %cst_80 [0] : vector<1x8x128xf32> to vector<8x128xf32>
    %138 = arith.addf %134, %137 : vector<8x128xf32>
    %c3_81 = arith.constant 3 : index
    %c0_82 = arith.constant 0 : index
    %c0_83 = arith.constant 0 : index
    %139 = vector.load %arg9[%c3_81, %c0_82, %c0_83] : memref<4x8x128xf32, #tpu.memory_space<vmem>>, vector<1x8x128xf32>
    %140 = vector.shape_cast %139 : vector<1x8x128xf32> to vector<8x128xf32>
    %141 = vector.shape_cast %138 : vector<8x128xf32> to vector<1x8x128xf32>
    tpu.vector_store %arg9[%c3_81, %c0_82, %c0_83], %141 {strides = array<i32>} : memref<4x8x128xf32, #tpu.memory_space<vmem>>, vector<1x8x128xf32>,
    %c3_84 = arith.constant 3 : index
    %c0_85 = arith.constant 0 : index
    %c0_86 = arith.constant 0 : index
    %142 = vector.load %arg10[%c3_84, %c0_85, %c0_86] : memref<4x8x128xf32, #tpu.memory_space<vmem>>, vector<1x8x128xf32>
    %143 = vector.shape_cast %142 : vector<1x8x128xf32> to vector<8x128xf32>
    %144 = vector.shape_cast %123 : vector<8x128xf32> to vector<1x8x128xf32>
    %cst_87 = arith.constant dense<0.000000e+00> : vector<8x128xf32>
    %145 = vector.multi_reduction <add>, %144, %cst_87 [0] : vector<1x8x128xf32> to vector<8x128xf32>
    %146 = arith.addf %143, %145 : vector<8x128xf32>
    %c3_88 = arith.constant 3 : index
    %c0_89 = arith.constant 0 : index
    %c0_90 = arith.constant 0 : index
    %147 = vector.load %arg10[%c3_88, %c0_89, %c0_90] : memref<4x8x128xf32, #tpu.memory_space<vmem>>, vector<1x8x128xf32>
    %148 = vector.shape_cast %147 : vector<1x8x128xf32> to vector<8x128xf32>
    %149 = vector.shape_cast %146 : vector<8x128xf32> to vector<1x8x128xf32>
    tpu.vector_store %arg10[%c3_88, %c0_89, %c0_90], %149 {strides = array<i32>} : memref<4x8x128xf32, #tpu.memory_space<vmem>>, vector<1x8x128xf32>,
    %c0_i32_91 = arith.constant 0 : i32
    %150 = arith.cmpi eq, %arg2, %c0_i32_91 : i32
    %151 = arith.extui %150 : i1 to i32
    %c0_i32_92 = arith.constant 0 : i32
    %152 = arith.cmpi ne, %151, %c0_i32_92 : i32
    scf.if %152 {
      %c0_93 = arith.constant 0 : index
      %c0_94 = arith.constant 0 : index
      %c0_95 = arith.constant 0 : index
      %153 = vector.load %arg8[%c0_93, %c0_94, %c0_95] : memref<4x8x128xf32, #tpu.memory_space<vmem>>, vector<4x8x128xf32>
      %cst_96 = arith.constant dense<0.000000e+00> : vector<4x128xf32>
      %154 = vector.multi_reduction <add>, %153, %cst_96 [1] : vector<4x8x128xf32> to vector<4x128xf32>
      %cst_97 = arith.constant dense<0.000000e+00> : vector<4xf32>
      %155 = vector.multi_reduction <add>, %154, %cst_97 [1] : vector<4x128xf32> to vector<4xf32>
      %156 = vector.shape_cast %155 : vector<4xf32> to vector<4x1xf32>
      %c0_98 = arith.constant 0 : index
      %c0_99 = arith.constant 0 : index
      %c0_100 = arith.constant 0 : index
      %c0_101 = arith.constant 0 : index
      %157 = vector.load %arg5[%c0_98, %c0_99, %c0_100, %c0_101] : memref<1x1x4x1xf32, #tpu.memory_space<vmem>>, vector<1x1x4x1xf32>
      %158 = vector.shape_cast %157 : vector<1x1x4x1xf32> to vector<4x1xf32>
      %159 = vector.shape_cast %156 : vector<4x1xf32> to vector<1x1x4x1xf32>
      tpu.vector_store %arg5[%c0_98, %c0_99, %c0_100, %c0_101], %159 {strides = array<i32>} : memref<1x1x4x1xf32, #tpu.memory_space<vmem>>, vector<1x1x4x1xf32>,
      %c0_102 = arith.constant 0 : index
      %c0_103 = arith.constant 0 : index
      %c0_104 = arith.constant 0 : index
      %160 = vector.load %arg9[%c0_102, %c0_103, %c0_104] : memref<4x8x128xf32, #tpu.memory_space<vmem>>, vector<4x8x128xf32>
      %cst_105 = arith.constant dense<0.000000e+00> : vector<4x128xf32>
      %161 = vector.multi_reduction <add>, %160, %cst_105 [1] : vector<4x8x128xf32> to vector<4x128xf32>
      %cst_106 = arith.constant dense<0.000000e+00> : vector<4xf32>
      %162 = vector.multi_reduction <add>, %161, %cst_106 [1] : vector<4x128xf32> to vector<4xf32>
      %163 = vector.shape_cast %162 : vector<4xf32> to vector<4x1xf32>
      %c0_107 = arith.constant 0 : index
      %c0_108 = arith.constant 0 : index
      %c0_109 = arith.constant 0 : index
      %c0_110 = arith.constant 0 : index
      %164 = vector.load %arg6[%c0_107, %c0_108, %c0_109, %c0_110] : memref<1x1x4x1xf32, #tpu.memory_space<vmem>>, vector<1x1x4x1xf32>
      %165 = vector.shape_cast %164 : vector<1x1x4x1xf32> to vector<4x1xf32>
      %166 = vector.shape_cast %163 : vector<4x1xf32> to vector<1x1x4x1xf32>
      tpu.vector_store %arg6[%c0_107, %c0_108, %c0_109, %c0_110], %166 {strides = array<i32>} : memref<1x1x4x1xf32, #tpu.memory_space<vmem>>, vector<1x1x4x1xf32>,
      %c0_111 = arith.constant 0 : index
      %c0_112 = arith.constant 0 : index
      %c0_113 = arith.constant 0 : index
      %167 = vector.load %arg10[%c0_111, %c0_112, %c0_113] : memref<4x8x128xf32, #tpu.memory_space<vmem>>, vector<4x8x128xf32>
      %cst_114 = arith.constant dense<0.000000e+00> : vector<4x128xf32>
      %168 = vector.multi_reduction <add>, %167, %cst_114 [1] : vector<4x8x128xf32> to vector<4x128xf32>
      %cst_115 = arith.constant dense<0.000000e+00> : vector<4xf32>
      %169 = vector.multi_reduction <add>, %168, %cst_115 [1] : vector<4x128xf32> to vector<4xf32>
      %170 = vector.shape_cast %169 : vector<4xf32> to vector<4x1xf32>
      %c0_116 = arith.constant 0 : index
      %c0_117 = arith.constant 0 : index
      %c0_118 = arith.constant 0 : index
      %c0_119 = arith.constant 0 : index
      %171 = vector.load %arg7[%c0_116, %c0_117, %c0_118, %c0_119] : memref<1x1x4x1xf32, #tpu.memory_space<vmem>>, vector<1x1x4x1xf32>
      %172 = vector.shape_cast %171 : vector<1x1x4x1xf32> to vector<4x1xf32>
      %173 = vector.shape_cast %170 : vector<4x1xf32> to vector<1x1x4x1xf32>
      tpu.vector_store %arg7[%c0_116, %c0_117, %c0_118, %c0_119], %173 {strides = array<i32>} : memref<1x1x4x1xf32, #tpu.memory_space<vmem>>, vector<1x1x4x1xf32>,
    } else {
    }
    return
  }
  func.func @transform_0(%arg0: i32, %arg1: i32, %arg2: i32) -> (i32, i32, i32, i32) {
    %c1_i32 = arith.constant 1 : i32
    %0 = arith.muli %arg0, %c1_i32 : i32
    %1 = arith.addi %0, %arg2 : i32
    %c0_i32 = arith.constant 0 : i32
    %c0_i32_0 = arith.constant 0 : i32
    %c0_i32_1 = arith.constant 0 : i32
    return %arg1, %c0_i32, %1, %c0_i32_0 : i32, i32, i32, i32
  }
  func.func @transform_1(%arg0: i32, %arg1: i32, %arg2: i32) -> (i32, i32, i32) {
    %c1_i32 = arith.constant 1 : i32
    %0 = arith.muli %arg0, %c1_i32 : i32
    %1 = arith.addi %0, %arg2 : i32
    %c0_i32 = arith.constant 0 : i32
    %c0_i32_0 = arith.constant 0 : i32
    return %arg1, %1, %c0_i32 : i32, i32, i32
  }
  func.func @transform_2(%arg0: i32, %arg1: i32, %arg2: i32) -> (i32, i32, i32, i32) {
    %c0_i32 = arith.constant 0 : i32
    %c0_i32_0 = arith.constant 0 : i32
    %c0_i32_1 = arith.constant 0 : i32
    return %arg0, %arg1, %c0_i32, %c0_i32_0 : i32, i32, i32, i32
  }
  func.func @transform_3(%arg0: i32, %arg1: i32, %arg2: i32) -> (i32, i32, i32, i32) {
    %c0_i32 = arith.constant 0 : i32
    %c0_i32_0 = arith.constant 0 : i32
    %c0_i32_1 = arith.constant 0 : i32
    return %arg0, %arg1, %c0_i32, %c0_i32_0 : i32, i32, i32, i32
  }
  func.func @transform_4(%arg0: i32, %arg1: i32, %arg2: i32) -> (i32, i32, i32, i32) {
    %c0_i32 = arith.constant 0 : i32
    %c0_i32_0 = arith.constant 0 : i32
    %c0_i32_1 = arith.constant 0 : i32
    return %arg0, %arg1, %c0_i32, %c0_i32_0 : i32, i32, i32, i32
  }
}

</mosaic_0001>

<bundles_post_ra>
// kernel: tpu_custom_call.1
= control target key start
LH: loop header
LB: loop body
LE: loop exit
PB: predicated region body
PF: predicated region fallthrough
CT: control target
= control target key end

     0   :  { %10 = vsyncpa [#allocation6], 0  ;;  %s1254_s0 = inlined_call_operand.hbm [shape: f32[2,4,8,128], index: 0, kind: input, shape index: {}]   ;;  %s1255_s1 = inlined_call_operand.hbm [shape: s32[2,8,128], index: 1, kind: input, shape index: {}]   ;;  %s1256_s2 = inlined_call_operand.vmem [shape: f32[1,2,4,1], index: 2, kind: output, shape index: {0}]   ;;  %s1257_s3 = inlined_call_operand.vmem [shape: f32[1,2,4,1], index: 3, kind: output, shape index: {1}]   ;;  %s1258_s4 = inlined_call_operand.vmem [shape: f32[1,2,4,1], index: 4, kind: output, shape index: {2}]  }
   0x1   :  { %12 = vsyncpa [#allocation6 + $0x1], 0 }
   0x2   :  { %13 = vsyncpa [#allocation8], 0 }
   0x3   :  { %15 = vsyncpa [#allocation8 + $0x1], 0  ;;  %s1045_s15 = smov 0   ;;  %s1047_s16 = smov 0  }
   0x4   :  { %s1049_s17 = smov 0   ;;  %s1051_s18 = smov 0  }
   0x5   :  { %s1053_s19 = smov 0   ;;  %s1055_s20 = smov 0  }
   0x6 LB: > { %s803_s21 = sadd.s32 4294967295, %s1013_s20   ;;  %s36_s22 = sadd.s32 1, %s1009_s19  ;;  %s1013_s20 = sphi %s1055_s20, %s21_s20   ;;  %s1009_s19 = sphi %s1053_s19, %s1270_s19   ;;  %s1005_s18 = sphi %s1051_s18, %s1269_s18   ;;  %s1001_s17 = sphi %s1049_s17, %s1268_s17   ;;  %s997_s16 = sphi %s1047_s16, %s1267_s16   ;;  %s993_s15 = sphi %s1045_s15, %s1266_s15  }
   0x7   : > { %p38_p0 = scmp.ge.s32.totalorder %s36_s22, 2  ;;  %s51_s23 = sadd.s32 1, %s1001_s17 }
   0x8   : > { %p58_p1 = scmp.ne.s32.totalorder %s1001_s17, %s997_s16  ;;  %p59_p2 = scmp.eq.s32.totalorder %s1013_s20, 0 }
   0x9   : > { %s1272_s22 = smov (%p38_p0, %s36_s22), 0  ;;  %p64_p4 = scmp.ne.s32.totalorder %s997_s16, %s993_s15 }
   0xa   : > { %p1081_p3 = por %p59_p2, %p58_p1  ;;  %s46_s25 = ssub.s32 %s1009_s19, %s1272_s22 }
   0xb   : > { %p65_p5 = scmp.eq.s32.totalorder %s803_s21, 0  ;;  %p49_p6 = scmp.eq.s32.totalorder %s46_s25, 0 }
   0xc   : > { %p837_p8 = scmp.lt.s32.totalorder %s1013_s20, 2  ;;  %s1097_s28 = sand.u32 1, %s1001_s17  }
   0xd   : > { %p1088_p7 = por %p65_p5, %p64_p4  ;;  %s825_s29 = sshll.u32 %s1009_s19, 9 }
   0xe   : > { %s1094_s27 = scalar_select %p49_p6, %s1001_s17, %s51_s23  }
   0xf   : > { %s1261_s26 = scalar_select %p1088_p7, 1, 0 }
  0x10   : > { %s807_s30 = sshll.u32 %s1097_s28, 5  ;;  %s1104_s7 = scalar_lea.hbm %s1254_s0, %s825_s29 }
  0x11   : > { %s206_s8 = scalar_lea.vmem [#allocation5], %s807_s30  ;;  %p1108_p9 = pnand %p837_p8, %p1081_p3 }
  0x12   : > { %s215_s9 = sshll.u32 %s206_s8, 4  ;;  %s203_s11 = scalar_lea.sflag [#allocation6], %s1097_s28  ;;  %s1112_s9 = int_to_ptr.vmem [resolvable:$true] %s215_s9 }
  0x13   : > { %s899_s12 = scalar_lea.hbm %s1104_s7, 512  ;;  %p901_p11 = pneg %p1108_p9 }
  0x14   : > { %p900_p10 = scmp.ne.s32.totalorder %s1104_s7, %s899_s12  ;;  %s904_s15 = scalar_lea.hbm %s1254_s0, 1024 }
  0x15   : > { %p905_p0 = scmp.lt.u32.totalorder %s1104_s7, %s1254_s0  ;;  %p906_p1 = scmp.lt.u32.totalorder %s904_s15, %s899_s12 }
  0x16   : > { %p902_p12 = pnand %p901_p11, %p900_p10  ;;  %p908_p3 = scmp.lt.u32.totalorder %s899_s12, %s1104_s7 }
  0x17   : > { %p907_p2 = por %p906_p1, %p905_p0 }
  0x18   : > { %p903_p13 = pneg %p902_p12 }
  0x19   : > { %p909_p4 = por %p908_p3, %p907_p2 }
  0x1b   : > { %p910_p5 = pnand %p909_p4, %p903_p13 }
  0x1d   : > { %913 = shalt.err (!%p910_p5)
}
  0x1e   : > { %s914_s24 = scalar_lea.vmem %s1112_s9, 512  ;;  %s1015_s25 = smov [#allocation5]  }
  0x1f   : > { %p915_p6 = scmp.ne.s32.totalorder %s1112_s9, %s914_s24  ;;  %s919_s29 = sshll.u32 %s1015_s25, 4  ;;  %s920_s29 = int_to_ptr.vmem [resolvable:$false] %s919_s29 }
  0x20   : > { %s921_s30 = scalar_lea.vmem %s920_s29, 1024  ;;  %p922_p12 = scmp.lt.s32.totalorder %s1112_s9, %s920_s29 }
  0x21   : > { %p917_p8 = pnand %p915_p6, %p901_p11  ;;  %p923_p0 = scmp.lt.s32.totalorder %s921_s30, %s914_s24 }
  0x23   : > { %p918_p10 = pneg %p917_p8  ;;  %p924_p1 = por %p923_p0, %p922_p12 }
  0x25   : > { %p925_p2 = pnand %p924_p1, %p918_p10 }
  0x27   : > { %928 = shalt.err (!%p925_p2)
}
  0x28   : > { %s1016_s5 = smov 128   ;;  %s1017_s6 = smov 8  }
  0x29   : > { %833 = dma.hbm_to_vmem [thread:$0]  (!%p1108_p9), %s1104_s7, 512, %s1112_s9, %s203_s11, %s1016_s5, %s1016_s5, %s1017_s6  }
  0x2a   : > { %p812_p13 = scmp.ge.s32.totalorder %s1013_s20, 1  ;;  %p243_p3 = scmp.lt.s32.totalorder %s1013_s20, 3 }
  0x2b   : > { %s810_s8 = sshll.u32 %s1097_s28, 3  ;;  %s811_s13 = sshll.u32 %s1009_s19, 7 }
  0x2c   : > { %p1145_p4 = pnand %p812_p13, %p243_p3  ;;  %s229_s14 = scalar_lea.vmem [#allocation7], %s810_s8 }
  0x2d   : > { %s238_s15 = sshll.u32 %s229_s14, 4  ;;  %s1153_s24 = scalar_lea.hbm %s1255_s1, %s811_s13  ;;  %s239_s15 = int_to_ptr.vmem [resolvable:$true] %s238_s15 }
  0x2e   : > { %s1263_s12 = scalar_select %p1145_p4, 1, 0 }
  0x2f   : > { %s226_s7 = scalar_lea.sflag [#allocation8], %s1097_s28  ;;  %s929_s9 = scalar_lea.hbm %s1153_s24, 128 }
  0x30   : > { %p930_p5 = scmp.ne.s32.totalorder %s1153_s24, %s929_s9  ;;  %s934_s29 = scalar_lea.hbm %s1255_s1, 256 }
  0x31   : > { %p935_p10 = scmp.lt.u32.totalorder %s1153_s24, %s1255_s1  ;;  %p936_p12 = scmp.lt.u32.totalorder %s934_s29, %s929_s9 }
  0x32   : > { %p932_p6 = pnand %p930_p5, %p901_p11  ;;  %p938_p1 = scmp.lt.u32.totalorder %s929_s9, %s1153_s24 }
  0x33   : > { %p937_p0 = por %p936_p12, %p935_p10 }
  0x34   : > { %p933_p8 = pneg %p932_p6 }
  0x35   : > { %p939_p2 = por %p938_p1, %p937_p0 }
  0x37   : > { %p940_p13 = pnand %p939_p2, %p933_p8 }
  0x39   : > { %943 = shalt.err (!%p940_p13)
}
  0x3a   : > { %s944_s28 = scalar_lea.vmem %s239_s15, 128  ;;  %s1018_s6 = smov [#allocation7]  }
  0x3b   : > { %p945_p3 = scmp.ne.s32.totalorder %s239_s15, %s944_s28  ;;  %s949_s8 = sshll.u32 %s1018_s6, 4  ;;  %s950_s8 = int_to_ptr.vmem [resolvable:$false] %s949_s8 }
  0x3c   : > { %s951_s13 = scalar_lea.vmem %s950_s8, 256  ;;  %p952_p7 = scmp.lt.s32.totalorder %s239_s15, %s950_s8 }
  0x3d   : > { %p947_p5 = pnand %p945_p3, %p901_p11  ;;  %p953_p4 = scmp.lt.s32.totalorder %s951_s13, %s944_s28 }
  0x3f   : > { %p948_p6 = pneg %p947_p5  ;;  %p954_p10 = por %p953_p4, %p952_p7 }
  0x41   : > { %p955_p12 = pnand %p954_p10, %p948_p6 }
  0x43   : > { %958 = shalt.err (!%p955_p12)
}
  0x44   : > { %836 = dma.hbm_to_vmem [thread:$0]  (!%p1108_p9), %s1153_s24, 128, %s239_s15, %s226_s7  }
  0x45   : > { %p1264_p8 = scmp.ne.s32.totalorder %s1263_s12, 0 }
  0x46   : > { %s249_s14 = sand.u32 (!%p1264_p8), 1, %s997_s16   ;;  %p1265_p11 = scmp.ne.s32.totalorder (!%p1264_p8), %s1261_s26, 0 }
  0x47   : > { %247 = sbr.rel (%p1264_p8) target bundleno = 288 (0x120), region = 28  ;;  %s813_s21 = sshll.u32 (!%p1264_p8), %s249_s14, 5 }
  0x48   : > { %s250_s23 = scalar_lea.sflag (!%p1264_p8), [#allocation6], %s249_s14  ;;  %s253_s9 = scalar_lea.vmem (!%p1264_p8), [#allocation5], %s813_s21 }
  0x4e   : > { %984 = dma.done.wait (%p1265_p11), %s250_s23, 512  }
  0x4f   : > { %986 = vsyncadd (%p1265_p11), %s250_s23, 4294966784  ;;  %s814_s11 = sshll.u32 %s249_s14, 3  ;;  %s259_s25 = scalar_lea.sflag [#allocation8], %s249_s14 }
  0x50   : > { %s262_s10 = scalar_lea.vmem [#allocation7], %s814_s11 }
  0x51   : > { %988 = dma.done.wait (%p1265_p11), %s259_s25, 128  }
  0x52   : > { %990 = vsyncadd (%p1265_p11), %s259_s25, 4294967168  ;;  %v353_v0 = vld [vmem:[%s253_s9] sm:$0xff]  ;;  %v354_v1 = vld [vmem:[%s253_s9 + $0x8] sm:$0xff]  ;;  %v1019_v7 = vmov 0.0   ;;  %vm496_vm4 = vcmask 1041409   ;;  %vm498_vm5 = vcmask 1042434  }
  0x53   : > { %v355_v2 = vld [vmem:[%s253_s9 + $0x10] sm:$0xff]  ;;  %v356_v3 = vld [vmem:[%s253_s9 + $0x18] sm:$0xff]  ;;  %v357_v4 = vmax.f32 %v353_v0, %v354_v1  ;;  %v1186_v5 = vld [vmem:[%s262_s10] sm:$0xff]  ;;  %vm500_vm6 = vcmask 1043459   ;;  %vm503_vm7 = vcmask 1043456   ;;  %p315_p7 = scmp.lt.s32.totalorder %s1005_s18, 1 }
  0x54   : > { %v358_v6 = vmax.f32 %v355_v2, %v356_v3  ;;  %vm381_vm0 = vcmp.eq.s32.totalorder %v1186_v5, 0  ;;  %vm399_vm1 = vcmp.eq.s32.totalorder %v1186_v5, 1  ;;  %vm420_vm2 = vcmp.eq.s32.totalorder %v1186_v5, 2 }
  0x55   : > { %v1191_v8 = vsel %vm381_vm0, 1.0, %v1019_v7  ;;  %v1193_v9 = vsel %vm399_vm1, 1.0, %v1019_v7  ;;  %v1195_v10 = vsel %vm420_vm2, 1.0, %v1019_v7  ;;  %vm441_vm3 = vcmp.eq.s32.totalorder %v1186_v5, 3  ;;  %s1274_s18 = smov (!%p315_p7, %s1005_s18), 1 }
  0x56   : > { %v359_v11 = vmax.f32 %v357_v4, %v358_v6  ;;  %v1198_v12 = vsel %vm441_vm3, 1.0, %v1019_v7  ;;  %v553_v13 = vrot.slane %v1191_v8, 4  ;;  %v559_v14 = vrot.slane %v1193_v9, 4  ;;  %s815_s26 = sshll.u32 %s1274_s18, 2 }
  0x57   : > { %v565_v15 = vrot.slane %v1195_v10, 4  ;;  %v571_v16 = vrot.slane %v1198_v12, 4  ;;  %vm377_vm8 = vcmp.ge.s32.totalorder %v1186_v5, 0  ;;  %s336_s24 = scalar_lea.vmem %s1258_s4, %s815_s26  ;;  %vm507_vm9 = vcmask 3072   ;;  %s320_s30 = scalar_lea.vmem %s1256_s2, %s815_s26 }
  0x58   : > { %v360_v17 = vsub.f32 %v353_v0, %v359_v11  ;;  %v361_v18 = vsub.f32 %v354_v1, %v359_v11  ;;  %v362_v19 = vsub.f32 %v355_v2, %v359_v11  ;;  %v363_v20 = vsub.f32 %v356_v3, %v359_v11  ;;  %s328_s6 = scalar_lea.vmem %s1257_s3, %s815_s26 }
  0x59   : > { %v554_v21 = vadd.f32 %v1191_v8, %v553_v13  ;;  %v560_v22 = vadd.f32 %v1193_v9, %v559_v14  ;;  %v566_v23 = vadd.f32 %v1195_v10, %v565_v15  ;;  %v572_v24 = vadd.f32 %v1198_v12, %v571_v16 }
  0x5a   : > { %v364_v25 = vmul.f32 1.442695, %v360_v17  ;;  %v366_v26 = vmul.f32 1.442695, %v361_v18  ;;  %v368_v27 = vmul.f32 1.442695, %v362_v19 }
  0x5b   : > { %v370_v28 = vmul.f32 1.442695, %v363_v20  ;;  %v555_v29 = vrot.slane %v554_v21, 2  ;;  %v561_v30 = vrot.slane %v560_v22, 2  ;;  %v567_v31 = vrot.slane %v566_v23, 2 }
  0x5c   : > { %889 = vpow2.f32 %v364_v25  ;;  %v573_v32 = vrot.slane %v572_v24, 2  ;;  %v818_v57 = vsel %vm377_vm8, 1.0, %v1019_v7 }
  0x5d   : > { %891 = vpow2.f32 %v366_v26  ;;  %v556_v33 = vadd.f32 %v555_v29, %v554_v21  ;;  %v562_v34 = vadd.f32 %v561_v30, %v560_v22  ;;  %v568_v35 = vadd.f32 %v567_v31, %v566_v23 }
  0x5e   : > { %893 = vpow2.f32 %v368_v27  ;;  %v574_v36 = vadd.f32 %v573_v32, %v572_v24 }
  0x5f   : > { %895 = vpow2.f32 %v370_v28  ;;  %v557_v37 = vrot.slane %v556_v33, 1  ;;  %v563_v38 = vrot.slane %v562_v34, 1  ;;  %v569_v39 = vrot.slane %v568_v35, 1 }
  0x60   : > { %v575_v40 = vrot.slane %v574_v36, 1 }
  0x61   : > { %v558_v41 = vadd.f32 %v557_v37, %v556_v33  ;;  %v564_v42 = vadd.f32 %v563_v38, %v562_v34  ;;  %v570_v43 = vadd.f32 %v569_v39, %v568_v35 }
  0x62   : > { %v576_v44 = vadd.f32 %v575_v40, %v574_v36 }
  0x63   : > { %v581_v45 = vsel %vm496_vm4, %v564_v42, %v558_v41 }
  0x64   : > { %v582_v46 = vsel %vm498_vm5, %v570_v43, %v581_v45 }
  0x65   : > { %v583_v47 = vsel %vm500_vm6, %v576_v44, %v582_v46 }
  0x66   : > { %v890_v48 = vpop.eup %889  ;;  %v585_v49 = vsel %vm503_vm7, %v583_v47, 0.0 }
  0x67   : > { %v892_v50 = vpop.eup %891  ;;  %586 = vadd.xlane.f32.xlu1 %v585_v49 }
  0x68   : > { %v894_v51 = vpop.eup %893  ;;  %v372_v52 = vadd.f32 %v892_v50, %v890_v48 }
  0x69   : > { %v896_v53 = vpop.eup %895 }
  0x6a   : > { %v373_v54 = vadd.f32 %v894_v51, %v372_v52 }
  0x6c   : > { %v374_v55 = vadd.f32 %v896_v53, %v373_v54 }
  0x6e   : > { %897 = vrcp.f32 %v374_v55 }
  0x78   : > { %v898_v56 = vpop.eup %897 }
  0x79   : > { %v380_v58 = vmul.f32 %v898_v56, %v890_v48  ;;  %v398_v59 = vmul.f32 %v898_v56, %v892_v50  ;;  %v419_v60 = vmul.f32 %v898_v56, %v894_v51  ;;  %v440_v61 = vmul.f32 %v898_v56, %v896_v53 }
  0x7b   : > { %v385_v62 = vmul.f32 %v1191_v8, %v380_v58  ;;  %v404_v63 = vmul.f32 %v1193_v9, %v398_v59  ;;  %v425_v0 = vmul.f32 %v1195_v10, %v419_v60  ;;  %v446_v1 = vmul.f32 %v1198_v12, %v440_v61 }
  0x7c   : > { %v390_v2 = vmul.f32 %v818_v57, %v380_v58  ;;  %v410_v3 = vmul.f32 %v818_v57, %v398_v59  ;;  %v431_v4 = vmul.f32 %v818_v57, %v419_v60  ;;  %v452_v6 = vmul.f32 %v818_v57, %v440_v61 }
  0x7d   : > { %v468_v11 = vrot.slane %v385_v62, 4  ;;  %v474_v5 = vrot.slane %v404_v63, 4  ;;  %v480_v13 = vrot.slane %v425_v0, 4  ;;  %v486_v7 = vrot.slane %v446_v1, 4 }
  0x7e   : > { %v513_v14 = vrot.slane %v390_v2, 4  ;;  %v519_v15 = vrot.slane %v410_v3, 4  ;;  %v525_v16 = vrot.slane %v431_v4, 4  ;;  %v531_v17 = vrot.slane %v452_v6, 4 }
  0x7f   : > { %v469_v18 = vadd.f32 %v468_v11, %v385_v62  ;;  %v475_v8 = vadd.f32 %v474_v5, %v404_v63  ;;  %v481_v19 = vadd.f32 %v480_v13, %v425_v0  ;;  %v487_v9 = vadd.f32 %v486_v7, %v446_v1 }
  0x80   : > { %v514_v20 = vadd.f32 %v513_v14, %v390_v2  ;;  %v520_v10 = vadd.f32 %v519_v15, %v410_v3  ;;  %v526_v21 = vadd.f32 %v525_v16, %v431_v4  ;;  %v532_v12 = vadd.f32 %v531_v17, %v452_v6 }
  0x81   : > { %v470_v22 = vrot.slane %v469_v18, 2  ;;  %v476_v23 = vrot.slane %v475_v8, 2  ;;  %v482_v24 = vrot.slane %v481_v19, 2  ;;  %v488_v25 = vrot.slane %v487_v9, 2 }
  0x82   : > { %v515_v26 = vrot.slane %v514_v20, 2  ;;  %v521_v27 = vrot.slane %v520_v10, 2  ;;  %v527_v28 = vrot.slane %v526_v21, 2  ;;  %v533_v29 = vrot.slane %v532_v12, 2 }
  0x83   : > { %v471_v30 = vadd.f32 %v470_v22, %v469_v18  ;;  %v477_v31 = vadd.f32 %v476_v23, %v475_v8  ;;  %v483_v32 = vadd.f32 %v482_v24, %v481_v19  ;;  %v489_v33 = vadd.f32 %v488_v25, %v487_v9 }
  0x84   : > { %v516_v34 = vadd.f32 %v515_v26, %v514_v20  ;;  %v522_v35 = vadd.f32 %v521_v27, %v520_v10  ;;  %v528_v36 = vadd.f32 %v527_v28, %v526_v21  ;;  %v534_v37 = vadd.f32 %v533_v29, %v532_v12 }
  0x85   : > { %v472_v38 = vrot.slane %v471_v30, 1  ;;  %v478_v39 = vrot.slane %v477_v31, 1  ;;  %v484_v40 = vrot.slane %v483_v32, 1  ;;  %v490_v41 = vrot.slane %v489_v33, 1 }
  0x86   : > { %v517_v42 = vrot.slane %v516_v34, 1  ;;  %v523_v43 = vrot.slane %v522_v35, 1  ;;  %v529_v44 = vrot.slane %v528_v36, 1  ;;  %v535_v45 = vrot.slane %v534_v37, 1 }
  0x87   : > { %v473_v46 = vadd.f32 %v472_v38, %v471_v30  ;;  %v479_v47 = vadd.f32 %v478_v39, %v477_v31  ;;  %v485_v48 = vadd.f32 %v484_v40, %v483_v32  ;;  %v491_v49 = vadd.f32 %v490_v41, %v489_v33 }
  0x88   : > { %v518_v50 = vadd.f32 %v517_v42, %v516_v34  ;;  %v524_v51 = vadd.f32 %v523_v43, %v522_v35  ;;  %v530_v52 = vadd.f32 %v529_v44, %v528_v36  ;;  %v536_v53 = vadd.f32 %v535_v45, %v534_v37 }
  0x89   : > { %v497_v54 = vsel %vm496_vm4, %v479_v47, %v473_v46 }
  0x8a   : > { %v499_v55 = vsel %vm498_vm5, %v485_v48, %v497_v54  ;;  %v541_v56 = vsel %vm496_vm4, %v524_v51, %v518_v50 }
  0x8b   : > { %v501_v57 = vsel %vm500_vm6, %v491_v49, %v499_v55  ;;  %v542_v58 = vsel %vm498_vm5, %v530_v52, %v541_v56 }
  0x8c   : > { %v504_v59 = vsel %vm503_vm7, %v501_v57, 0.0  ;;  %v543_v60 = vsel %vm500_vm6, %v536_v53, %v542_v58 }
  0x8d   : > { %505 = vadd.xlane.f32.xlu0 %v504_v59  ;;  %v545_v61 = vsel %vm503_vm7, %v543_v60, 0.0 }
  0x91   : > { %546 = vadd.xlane.f32.xlu0 %v545_v61 }
  0xf4   : > { %v587_v62 = vpop.xlane.xlu1 %586 }
  0xf5   : > { %588 = vst.msk [vmem:[%s336_s24] sm:$0xf] %vm507_vm9, %v587_v62 }
 0x11a   : > { %v506_v63 = vpop.xlane.xlu0 %505 }
 0x11b   : > { %508 = vst.msk [vmem:[%s320_s30] sm:$0xf] %vm507_vm9, %v506_v63 }
 0x11e   : > { %v547_v0 = vpop.xlane.xlu0 %546 }
 0x11f   : > { %548 = vst.msk [vmem:[%s328_s6] sm:$0xf] %vm507_vm9, %v547_v0 }
 0x120 PF: > { %s21_s20 = sadd.s32 1, %s1013_s20   ;;  %s1266_s15 = smov %s997_s16 }
 0x121   : > { %p18_p9 = scmp.ge.s32.totalorder %s21_s20, 4   ;;  %s1267_s16 = smov %s1001_s17 }
 0x122   : > { %s1268_s17 = smov %s1094_s27  ;;  %s1269_s18 = smov %s1009_s19 }
 0x123   : > { %s1270_s19 = smov %s1272_s22  ;;  %20 = sbr.rel (!%p18_p9) target bundleno = 6 (0x6), region = 122 }
 0x12a   :  { %660 = vsyncpa [#allocation6], 1 }
 0x12b   :  { %662 = vsyncpa [#allocation6 + $0x1], 1 }
 0x12c   :  { %663 = vsyncpa [#allocation8], 1 }
 0x12d   :  { %665 = vsyncpa [#allocation8 + $0x1], 1 }

</bundles_post_ra>
